<compile_context>
chip_gen: v6e
topology: v6e:2x2x1
jax: 0.10.0
libtpu: 0.0.40
codegen_flags: <defaults>
</compile_context>

<pallas_src>
import jax
import jax.numpy as jnp
from jax import lax
from jax.experimental import pallas as pl
from jax.experimental.pallas import tpu as pltpu


_RING = 8                       # DMA-semaphore ring depth for the HBM fallback path
_VMEM_TABLE_BYTES = 2 << 20     # <= 2 MiB (padded) table -> VMEM-resident fast path
                                # (double-buffered by BlockSpec => <= 4 MiB VMEM; safe
                                #  even under v7x's 32 MiB scoped default)


def _any_id_bad(ids_ref, batch, num_subjects):
    """Scalar-unit check: 1 iff any prefetched id is outside [0, num_subjects)."""
    if batch <= 32:                               # static unroll for small batch
        bad = jnp.int32(0)
        for i in range(batch):
            sid = ids_ref[i]
            bad = bad | ((sid < 0) | (sid >= num_subjects)).astype(jnp.int32)
        return bad

    def body(i, bad):
        sid = ids_ref[i]
        return bad | ((sid < 0) | (sid >= num_subjects)).astype(jnp.int32)

    return lax.fori_loop(0, batch, body, jnp.int32(0))


def _subject_embedding_vmem_kernel(ids_ref, table_ref, shared_ref, out_ref):
    # ids_ref:    SMEM (B,)                int32  (scalar prefetch)
    # table_ref:  VMEM (num_subjects, Dp)  float  (whole table resident)
    # shared_ref: VMEM (1, Dp)             float
    # out_ref:    VMEM (B, Dp)             float  (single lane-dense output block)
    batch = out_ref.shape[0]
    num_subjects = table_ref.shape[0]
    bad = _any_id_bad(ids_ref, batch, num_subjects)

    @pl.when(bad == 0)
    def _gather():
        def copy_row(i):
            sid = jnp.clip(ids_ref[i], 0, num_subjects - 1)   # belt-and-suspenders
            out_ref[pl.ds(i, 1), :] = table_ref[pl.ds(sid, 1), :]

        if batch <= 32:
            for i in range(batch):
                copy_row(i)
        else:
            def body(i, carry):
                copy_row(i)
                return carry
            lax.fori_loop(0, batch, body, jnp.int32(0))

    @pl.when(bad != 0)
    def _shared():
        out_ref[...] = jnp.broadcast_to(shared_ref[...], out_ref.shape)


def _subject_embedding_hbm_kernel(ids_ref, table_hbm, shared_ref, out_ref, sems):
    # ids_ref:    SMEM (B,)                int32  (scalar prefetch)
    # table_hbm:  HBM  (num_subjects, Dp)  float  (pl.ANY, no auto-DMA)
    # shared_ref: VMEM (1, Dp)             float
    # out_ref:    VMEM (B, Dp)             float  -- DMA destination (no staging buffer)
    # sems:       DMA semaphores, shape (_RING,)
    batch = out_ref.shape[0]
    num_subjects = table_hbm.shape[0]
    bad = _any_id_bad(ids_ref, batch, num_subjects)

    @pl.when(bad == 0)
    def _gather():
        def issue(i):
            sid = jnp.clip(ids_ref[i], 0, num_subjects - 1)
            pltpu.make_async_copy(
                table_hbm.at[pl.ds(sid, 1), :],
                out_ref.at[pl.ds(i, 1), :],
                sems.at[i % _RING],
            ).start()

        def wait(i):
            # Same (1, Dp) shape as the matching start -> same byte count.
            pltpu.make_async_copy(
                table_hbm.at[pl.ds(0, 1), :],
                out_ref.at[pl.ds(i, 1), :],
                sems.at[i % _RING],
            ).wait()

        # Prologue: fill the ring (all starts before any wait for small batches).
        for i in range(min(_RING, batch)):
            issue(i)

        @pl.loop(0, batch)
        def _(i):
            wait(i)

            @pl.when(i + _RING < batch)
            def _():
                issue(i + _RING)

    @pl.when(bad != 0)
    def _shared():
        out_ref[...] = jnp.broadcast_to(shared_ref[...], out_ref.shape)


def subject_embedding_forward(subject_ids, table, shared):
    """Pallas implementation of SubjectEmbedding.forward -> (B, 1, d_model)."""
    num_subjects, d_model = table.shape
    batch = subject_ids.shape[0]

    # Lane-dense feature dim (multiple of 128).  For production, store the
    # parameters pre-padded so this pad is not a per-call op.
    d_pad = ((d_model + 127) // 128) * 128
    if d_pad != d_model:
        table = jnp.pad(table, ((0, 0), (0, d_pad - d_model)))
        shared = jnp.pad(shared, ((0, 0), (0, d_pad - d_model)))

    ids = subject_ids.astype(jnp.int32)

    table_bytes = num_subjects * d_pad * jnp.dtype(table.dtype).itemsize
    use_vmem_table = table_bytes <= _VMEM_TABLE_BYTES

    if use_vmem_table:
        # Fast path: whole table resident in VMEM, in-VMEM gather, no DMAs/semaphores.
        grid_spec = pltpu.PrefetchScalarGridSpec(
            num_scalar_prefetch=1,                  # ids -> SMEM
            grid=(1,),                              # whole batch in one invocation
            in_specs=[
                pl.BlockSpec((num_subjects, d_pad), lambda g, ids: (0, 0)),
                pl.BlockSpec((1, d_pad), lambda g, ids: (0, 0)),
            ],
            out_specs=pl.BlockSpec((batch, d_pad), lambda g, ids: (0, 0)),
        )
        kernel = _subject_embedding_vmem_kernel
    else:
        # Fallback: table stays in HBM; requested rows DMA'd straight into out_ref
        # through a bounded semaphore ring.  HBM traffic is O(B * d_pad).
        grid_spec = pltpu.PrefetchScalarGridSpec(
            num_scalar_prefetch=1,
            grid=(1,),
            in_specs=[
                pl.BlockSpec(memory_space=pl.ANY),
                pl.BlockSpec((1, d_pad), lambda g, ids: (0, 0)),
            ],
            out_specs=pl.BlockSpec((batch, d_pad), lambda g, ids: (0, 0)),
            scratch_shapes=[pltpu.SemaphoreType.DMA((_RING,))],
        )
        kernel = _subject_embedding_hbm_kernel

    out = pl.pallas_call(
        kernel,
        out_shape=jax.ShapeDtypeStruct((batch, d_pad), table.dtype),
        grid_spec=grid_spec,
        compiler_params=pltpu.CompilerParams(dimension_semantics=("arbitrary",)),
    )(ids, table, shared)

    if d_pad != d_model:
        out = out[:, :d_model]
    # Glue: unsqueeze(1) done outside the kernel.
    return out.reshape(batch, 1, d_model)


def _reference(subject_ids, table, shared):
    num_subjects, d_model = table.shape
    batch = subject_ids.shape[0]
    use_shared = jnp.any((subject_ids < 0) | (subject_ids >= num_subjects))
    gathered = jnp.take(table, jnp.clip(subject_ids, 0, num_subjects - 1),
                        axis=0)[:, None, :]
    shared_exp = jnp.broadcast_to(shared[None, :, :], (batch, 1, d_model))
    return jnp.where(use_shared, shared_exp, gathered)


if __name__ == "__main__":
    num_subjects = 8
    d_model = 32
    batch = 2

    key = jax.random.PRNGKey(0)
    k_tab, k_sh, k_mask = jax.random.split(key, 3)
    # Deterministic "parameters" (nn.Embedding weight ~ N(0,1), nn.Parameter randn).
    subject_table = jax.random.normal(k_tab, (num_subjects, d_model), dtype=jnp.float32)
    shared_embedding = jax.random.normal(k_sh, (1, d_model), dtype=jnp.float32)
    mask_embedding = jax.random.normal(k_mask, (1, d_model), dtype=jnp.float32)  # unused in forward

    # Case 1: all ids valid -> in-VMEM gather path.
    subject_ids = jnp.array([3, 5], dtype=jnp.int32)
    out_valid = subject_embedding_forward(subject_ids, subject_table, shared_embedding)
    jax.block_until_ready(out_valid)

    # Case 2: an id out of range -> shared embedding path (no gather executed).
    subject_ids_bad = jnp.array([3, 100], dtype=jnp.int32)
    out_shared = subject_embedding_forward(subject_ids_bad, subject_table, shared_embedding)
    jax.block_until_ready(out_shared)

    ref_valid = _reference(subject_ids, subject_table, shared_embedding)
    ref_shared = _reference(subject_ids_bad, subject_table, shared_embedding)

    assert out_valid.shape == (batch, 1, d_model)
    assert out_shared.shape == (batch, 1, d_model)
    assert jnp.allclose(out_valid, ref_valid, atol=1e-6)
    assert jnp.allclose(out_shared, ref_shared, atol=1e-6)

    print("KERNEL_OK")
</pallas_src>

<mosaic_0001>
module attributes {stable_mosaic.version = 11 : i64} {
  func.func @_subject_embedding_vmem_kernel(%arg0: i32, %arg1: memref<2xi32, #tpu.memory_space<smem>>, %arg2: memref<8x128xf32, #tpu.memory_space<vmem>>, %arg3: memref<1x128xf32, #tpu.memory_space<vmem>>, %arg4: memref<2x128xf32, #tpu.memory_space<vmem>>) attributes {dimension_semantics = [#tpu.dimension_semantics<arbitrary>], iteration_bounds = array<i64: 1>, scalar_prefetch = 1 : i64, scratch_operands = 0 : i64, tpu.core_type = #tpu.core_type<tc>, window_params = [{pipeline_mode = #tpu.pipeline_mode<synchronous>, transform_indices = @transform_0, window_bounds = array<i64: 8, 128>}, {pipeline_mode = #tpu.pipeline_mode<synchronous>, transform_indices = @transform_1, window_bounds = array<i64: 1, 128>}, {pipeline_mode = #tpu.pipeline_mode<synchronous>, transform_indices = @transform_2, window_bounds = array<i64: 2, 128>}]} {
    %c0 = arith.constant 0 : index
    %0 = memref.load %arg1[%c0] : memref<2xi32, #tpu.memory_space<smem>>
    %c0_i32 = arith.constant 0 : i32
    %1 = arith.cmpi slt, %0, %c0_i32 : i32
    %c8_i32 = arith.constant 8 : i32
    %2 = arith.cmpi sge, %0, %c8_i32 : i32
    %3 = arith.ori %1, %2 : i1
    %4 = arith.extui %3 : i1 to i32
    %c0_i32_0 = arith.constant 0 : i32
    %5 = arith.ori %c0_i32_0, %4 : i32
    %c1 = arith.constant 1 : index
    %6 = memref.load %arg1[%c1] : memref<2xi32, #tpu.memory_space<smem>>
    %c0_i32_1 = arith.constant 0 : i32
    %7 = arith.cmpi slt, %6, %c0_i32_1 : i32
    %c8_i32_2 = arith.constant 8 : i32
    %8 = arith.cmpi sge, %6, %c8_i32_2 : i32
    %9 = arith.ori %7, %8 : i1
    %10 = arith.extui %9 : i1 to i32
    %11 = arith.ori %5, %10 : i32
    %c0_i32_3 = arith.constant 0 : i32
    %12 = arith.cmpi eq, %11, %c0_i32_3 : i32
    %13 = arith.extui %12 : i1 to i32
    %c0_i32_4 = arith.constant 0 : i32
    %14 = arith.cmpi ne, %13, %c0_i32_4 : i32
    scf.if %14 {
      %c0_7 = arith.constant 0 : index
      %18 = memref.load %arg1[%c0_7] : memref<2xi32, #tpu.memory_space<smem>>
      %c0_i32_8 = arith.constant 0 : i32
      %c7_i32 = arith.constant 7 : i32
      %19 = arith.maxsi %c0_i32_8, %18 : i32
      %20 = arith.minsi %c7_i32, %19 : i32
      %21 = arith.index_cast %20 : i32 to index
      %c0_9 = arith.constant 0 : index
      %22 = vector.load %arg2[%21, %c0_9] : memref<8x128xf32, #tpu.memory_space<vmem>>, vector<1x128xf32>
      %c0_10 = arith.constant 0 : index
      %c0_11 = arith.constant 0 : index
      %23 = vector.load %arg4[%c0_10, %c0_11] : memref<2x128xf32, #tpu.memory_space<vmem>>, vector<1x128xf32>
      tpu.vector_store %arg4[%c0_10, %c0_11], %22 {strides = array<i32>} : memref<2x128xf32, #tpu.memory_space<vmem>>, vector<1x128xf32>,
      %c1_12 = arith.constant 1 : index
      %24 = memref.load %arg1[%c1_12] : memref<2xi32, #tpu.memory_space<smem>>
      %c0_i32_13 = arith.constant 0 : i32
      %c7_i32_14 = arith.constant 7 : i32
      %25 = arith.maxsi %c0_i32_13, %24 : i32
      %26 = arith.minsi %c7_i32_14, %25 : i32
      %27 = arith.index_cast %26 : i32 to index
      %c0_15 = arith.constant 0 : index
      %28 = vector.load %arg2[%27, %c0_15] : memref<8x128xf32, #tpu.memory_space<vmem>>, vector<1x128xf32>
      %c1_16 = arith.constant 1 : index
      %c0_17 = arith.constant 0 : index
      %29 = vector.load %arg4[%c1_16, %c0_17] : memref<2x128xf32, #tpu.memory_space<vmem>>, vector<1x128xf32>
      tpu.vector_store %arg4[%c1_16, %c0_17], %28 {strides = array<i32>} : memref<2x128xf32, #tpu.memory_space<vmem>>, vector<1x128xf32>,
    } else {
    }
    %c0_i32_5 = arith.constant 0 : i32
    %15 = arith.cmpi ne, %11, %c0_i32_5 : i32
    %16 = arith.extui %15 : i1 to i32
    %c0_i32_6 = arith.constant 0 : i32
    %17 = arith.cmpi ne, %16, %c0_i32_6 : i32
    scf.if %17 {
      %c0_7 = arith.constant 0 : index
      %c0_8 = arith.constant 0 : index
      %18 = vector.load %arg3[%c0_7, %c0_8] : memref<1x128xf32, #tpu.memory_space<vmem>>, vector<1x128xf32>
      %19 = vector.shape_cast %18 : vector<1x128xf32> to vector<1x128xf32>
      %20 = vector.broadcast %19 : vector<1x128xf32> to vector<2x128xf32>
      %c0_9 = arith.constant 0 : index
      %c0_10 = arith.constant 0 : index
      %21 = vector.load %arg4[%c0_9, %c0_10] : memref<2x128xf32, #tpu.memory_space<vmem>>, vector<2x128xf32>
      tpu.vector_store %arg4[%c0_9, %c0_10], %20 {strides = array<i32>} : memref<2x128xf32, #tpu.memory_space<vmem>>, vector<2x128xf32>,
    } else {
    }
    return
  }
  func.func @transform_0(%arg0: i32, %arg1: memref<2xi32, #tpu.memory_space<smem>>) -> (i32, i32) {
    %c0_i32 = arith.constant 0 : i32
    %c0_i32_0 = arith.constant 0 : i32
    %c0_i32_1 = arith.constant 0 : i32
    return %c0_i32, %c0_i32_0 : i32, i32
  }
  func.func @transform_1(%arg0: i32, %arg1: memref<2xi32, #tpu.memory_space<smem>>) -> (i32, i32) {
    %c0_i32 = arith.constant 0 : i32
    %c0_i32_0 = arith.constant 0 : i32
    %c0_i32_1 = arith.constant 0 : i32
    return %c0_i32, %c0_i32_0 : i32, i32
  }
  func.func @transform_2(%arg0: i32, %arg1: memref<2xi32, #tpu.memory_space<smem>>) -> (i32, i32) {
    %c0_i32 = arith.constant 0 : i32
    %c0_i32_0 = arith.constant 0 : i32
    %c0_i32_1 = arith.constant 0 : i32
    return %c0_i32, %c0_i32_0 : i32, i32
  }
}

</mosaic_0001>

<bundles_post_ra>
// kernel: tpu_custom_call.1
= control target key start
LH: loop header
LB: loop body
LE: loop exit
PB: predicated region body
PF: predicated region fallthrough
CT: control target
= control target key end

     0   :  { %s162_s12 = smov [#allocation3]   ;;  %s219_s0 = inlined_call_operand.hbm [shape: s32[2], index: 0, kind: input, shape index: {}]   ;;  %s220_s1 = inlined_call_operand.hbm [shape: f32[8,128], index: 1, kind: input, shape index: {}]   ;;  %s221_s2 = inlined_call_operand.vmem [shape: f32[1,128], index: 2, kind: input, shape index: {}]   ;;  %s222_s3 = inlined_call_operand.hbm [shape: f32[2,128], index: 3, kind: output, shape index: {}]  }
   0x1   :  { %9 = dma.hbm_to_smem %s219_s0, 16, %s162_s12, [#allocation2] }
   0x2   :  { %156 = dma.done.wait [#allocation2], 16 }
   0x3   :  { %157 = vsyncadd [#allocation2], 4294967280 }
   0x4   :  { %11 = sfence }
   0x5   :  { %12 = vsyncpa [#allocation5], 0 }
   0x6   :  { %13 = vsyncpa [#allocation6], 0  ;;  %s163_s15 = smov [#allocation4]  }
   0x7   :  { %s20_s16 = sshll.u32 %s163_s15, 4  ;;  %s21_s16 = int_to_ptr.vmem [resolvable:$true] %s20_s16 }
   0x8   :  { %s124_s17 = scalar_lea.vmem %s21_s16, 128  ;;  %p129_p1 = scmp.lt.s32.totalorder %s21_s16, %s21_s16 }
   0x9   :  { %p125_p0 = scmp.ne.s32.totalorder %s21_s16, %s124_s17  ;;  %p130_p2 = scmp.lt.s32.totalorder %s124_s17, %s124_s17 }
   0xb   :  { %p131_p3 = por %p130_p2, %p129_p1 }
   0xd   :  { %p132_p4 = pnand %p131_p3, %p125_p0 }
   0xf   :  { %135 = shalt.err (!%p132_p4)
}
  0x10   :  { %23 = dma.hbm_to_vmem [thread:$0]  %s220_s1, 128, %s21_s16, [#allocation5]  }
  0x11   :  { %158 = dma.done.wait [#allocation5], 128  }
  0x12   :  { %159 = vsyncadd [#allocation5], 4294967168  ;;  %s29_s0 = sld [smem:[#allocation3]] }
  0x13   :  { %s87_s20 = sld [smem:[#allocation3 + $0x1]] }
  0x18   :  { %p30_p5 = scmp.lt.s32.totalorder %s29_s0, 0  ;;  %p31_p6 = scmp.ge.s32.totalorder %s29_s0, 8 }
  0x19   :  { %p34_p7 = scmp.lt.s32.totalorder %s87_s20, 0  ;;  %p35_p8 = scmp.ge.s32.totalorder %s87_s20, 8 }
  0x1a   :  { %p191_p9 = por %p31_p6, %p30_p5 }
  0x1b   :  { %p195_p10 = por %p35_p8, %p34_p7 }
  0x1d   :  { %p37_p11 = por %p195_p10, %p191_p9 }
  0x1e   :  { %s43_s1 = sld [smem:[#allocation3]] (!%p37_p11) }
  0x1f   :  { %42 = sbr.rel (%p37_p11) target bundleno = 44 (0x2c), region = 17  ;;  %s94_s23 = sld [smem:[#allocation3 + $0x1]] (!%p37_p11) }
  0x24   :  { %p44_p12 = scmp.gt.s32.totalorder %s43_s1, 0  ;;  %p89_p13 = scmp.lt.s32.totalorder %s43_s1, 7 }
  0x25   :  { %p52_p0 = scmp.gt.s32.totalorder %s94_s23, 0  ;;  %p95_p1 = scmp.lt.s32.totalorder %s94_s23, 7 }
  0x26   :  { %s226_s1 = smov (!%p44_p12, %s43_s1), 0 }
  0x27   :  { %s228_s23 = smov (!%p52_p0, %s94_s23), 0  ;;  %s230_s1 = smov (!%p89_p13, %s226_s1), 7 }
  0x28   :  { %s232_s23 = smov (!%p95_p1, %s228_s23), 7  ;;  %s48_s24 = scalar_lea.vmem [#allocation4], %s230_s1 }
  0x29   :  { %v49_v0 = vld [vmem:[%s48_s24] sm:$0x1]  ;;  %s56_s25 = scalar_lea.vmem [#allocation4], %s232_s23 }
  0x2a   :  { %50 = vst [vmem:[#allocation7] sm:$0x1] %v49_v0  ;;  %v57_v1 = vld [vmem:[%s56_s25] sm:$0x1] }
  0x2b   :  { %58 = vst [vmem:[#allocation7 + $0x1] sm:$0x1] %v57_v1 }
  0x2c PF:  { %61 = sbr.rel (!%p37_p11) target bundleno = 49 (0x31), region = 21  ;;  %v100_v2 = vld [vmem:[%s221_s2] ss:$0 sm:$0xff] (%p37_p11) }
  0x2d   :  { %69 = vst [vmem:[#allocation7] sm:$0x3] (%p37_p11), %v100_v2 }
  0x31 PF:  { %s164_s28 = smov [#allocation7]  }
  0x32   :  { %s76_s29 = sshll.u32 %s164_s28, 4  ;;  %s77_s29 = int_to_ptr.vmem [resolvable:$true] %s76_s29 }
  0x33   :  { %s136_s30 = scalar_lea.vmem %s77_s29, 32  ;;  %p141_p3 = scmp.lt.s32.totalorder %s77_s29, %s77_s29 }
  0x34   :  { %p137_p2 = scmp.ne.s32.totalorder %s77_s29, %s136_s30  ;;  %p142_p4 = scmp.lt.s32.totalorder %s136_s30, %s136_s30 }
  0x36   :  { %p143_p5 = por %p142_p4, %p141_p3 }
  0x38   :  { %p144_p6 = pnand %p143_p5, %p137_p2 }
  0x3a   :  { %147 = shalt.err (!%p144_p6)
}
  0x3b   :  { %79 = dma.vmem_to_hbm [thread:$0]  %s77_s29, 32, %s222_s3, [#allocation6]  }
  0x3c   :  { %160 = dma.done.wait [#allocation6], 32  }
  0x3d   :  { %161 = vsyncadd [#allocation6], 4294967264 }
  0x3e   :  { %83 = vsyncpa [#allocation5], 1 }
  0x3f   :  { %84 = vsyncpa [#allocation6], 1 }

</bundles_post_ra>
